<compile_context>
chip_gen: v7x
topology: tpu7x:2x2x1
jax: 0.10.0
libtpu: 0.0.40
codegen_flags: <defaults>
</compile_context>

<pallas_src>
import functools
import math

import jax
import jax.numpy as jnp
from jax.experimental import pallas as pl
from jax.experimental.pallas import tpu as pltpu

LANE = 128  # vreg lane width


def _round_up(x, m):
    return ((x + m - 1) // m) * m


def _device_kind():
    try:
        return jax.devices()[0].device_kind.lower()
    except Exception:
        return ""


def default_epilogue_dtype():
    # v6e / v7x have a bf16 VPU -> bf16 epilogue halves VALU + vreg pressure.
    # v5e (and anything unknown) keeps the f32 epilogue.
    kind = _device_kind()
    return jnp.bfloat16 if ("v6" in kind or "v7" in kind) else jnp.float32


def min_batch_tiles():
    # v7x has two TensorCores per chip: give the parallel batch axis >=2 steps.
    return 2 if "v7" in _device_kind() else 1


# ----------------------------------------------------------------------------
# Kernel
# ----------------------------------------------------------------------------
def adapter_kernel(x_ref, w1_ref, w2_ref, w3_ref, b_ref, o_ref, *,
                   h1p, h2p, compute_dtype, epilogue_dtype):
    # fc1: cast f32 activations to bf16 on the VPU (hidden under the matmul),
    # accumulate in f32 on the MXU; bias+ReLU in the chip-appropriate dtype.
    x = x_ref[...].astype(compute_dtype)
    h = jnp.dot(x, w1_ref[...], preferred_element_type=jnp.float32)
    h = jnp.maximum(h.astype(epilogue_dtype) + b_ref[:, 0:h1p], 0)
    # fc2
    h = jnp.dot(h.astype(compute_dtype), w2_ref[...],
                preferred_element_type=jnp.float32)
    h = jnp.maximum(h.astype(epilogue_dtype) + b_ref[:, h1p:h1p + h2p], 0)
    # fc3 (unpadded N -> direct, unpadded output store)
    h = jnp.dot(h.astype(compute_dtype), w3_ref[...],
                preferred_element_type=jnp.float32)
    h = jnp.maximum(h.astype(epilogue_dtype) + b_ref[:, h1p + h2p:], 0)
    o_ref[...] = h.astype(o_ref.dtype)


# ----------------------------------------------------------------------------
# One-time parameter prep (NOT per forward call)
# ----------------------------------------------------------------------------
def prepare_params(params, *, compute_dtype=jnp.bfloat16, epilogue_dtype=None):
    """Pad hidden dims to 128 lanes, cast weights to the MXU dtype and merge
    the three biases into one buffer. Call once; reuse for every forward."""
    if epilogue_dtype is None:
        epilogue_dtype = default_epilogue_dtype()

    w1, b1 = params["w1"], params["b1"]   # (in, h1), (1, h1)
    w2, b2 = params["w2"], params["b2"]   # (h1, h2), (1, h2)
    w3, b3 = params["w3"], params["b3"]   # (h2, out), (1, out)
    in_dim, h1 = w1.shape
    h2 = w2.shape[1]
    out_dim = w3.shape[1]
    h1p, h2p = _round_up(h1, LANE), _round_up(h2, LANE)

    # Zero padding preserves the math: padded hidden channels stay exactly 0
    # through bias-add (padded bias = 0) and ReLU.
    w1p = jnp.zeros((in_dim, h1p), compute_dtype).at[:, :h1].set(w1.astype(compute_dtype))
    w2p = jnp.zeros((h1p, h2p), compute_dtype).at[:h1, :h2].set(w2.astype(compute_dtype))
    w3p = jnp.zeros((h2p, out_dim), compute_dtype).at[:h2, :].set(w3.astype(compute_dtype))

    bias = jnp.zeros((1, h1p + h2p + out_dim), epilogue_dtype)
    bias = bias.at[:, :h1].set(b1.astype(epilogue_dtype))
    bias = bias.at[:, h1p:h1p + h2].set(b2.astype(epilogue_dtype))
    bias = bias.at[:, h1p + h2p:].set(b3.astype(epilogue_dtype))

    return {
        "w1": w1p, "w2": w2p, "w3": w3p, "bias": bias,
        "dims": (in_dim, h1, h2, out_dim, h1p, h2p),
        "compute_dtype": compute_dtype, "epilogue_dtype": epilogue_dtype,
    }


# ----------------------------------------------------------------------------
# Forward
# ----------------------------------------------------------------------------
def _pick_batch_tile(B, *, max_tile=256, min_tiles=1):
    # >= min_tiles grid steps (v7x megacore), no mostly-empty trailing tile,
    # rounded to 16 rows for bf16 sublane packing, capped at B (full extent).
    tiles = max(min_tiles, -(-B // max_tile))
    tiles = max(1, min(tiles, B // 16 if B >= 32 else 1))
    tb = _round_up(-(-B // tiles), 16)
    return min(tb, B)


def _build_adapter_call(B, in_dim, out_dim, h1p, h2p, tb, out_dtype,
                        compute_dtype, epilogue_dtype, bias_w, single_buffer):
    grid = (-(-B // tb),)

    def const_spec(shape):
        # Constant-index (resident) operands: double buffering buys nothing.
        if single_buffer:
            return pl.BlockSpec(shape, lambda i: (0, 0),
                                pipeline_mode=pl.Buffered(1))
        return pl.BlockSpec(shape, lambda i: (0, 0))

    kernel = functools.partial(
        adapter_kernel, h1p=h1p, h2p=h2p,
        compute_dtype=compute_dtype, epilogue_dtype=epilogue_dtype)

    flops = 2 * B * (in_dim * h1p + h1p * h2p + h2p * out_dim)
    bytes_accessed = (
        B * in_dim * 4 + B * out_dim * 4
        + (in_dim * h1p + h1p * h2p + h2p * out_dim)
        * jnp.dtype(compute_dtype).itemsize
        + bias_w * jnp.dtype(epilogue_dtype).itemsize)

    return pl.pallas_call(
        kernel,
        out_shape=jax.ShapeDtypeStruct((B, out_dim), out_dtype),
        grid=grid,
        in_specs=[
            pl.BlockSpec((tb, in_dim), lambda i: (i, 0)),   # x row tile (f32, unpadded)
            const_spec((in_dim, h1p)),                      # w1 (resident)
            const_spec((h1p, h2p)),                         # w2 (resident)
            const_spec((h2p, out_dim)),                     # w3 (resident)
            const_spec((1, bias_w)),                        # merged biases
        ],
        out_specs=pl.BlockSpec((tb, out_dim), lambda i: (i, 0)),
        compiler_params=pltpu.CompilerParams(
            dimension_semantics=("parallel",)),
        cost_estimate=pl.CostEstimate(
            flops=flops, transcendentals=0, bytes_accessed=bytes_accessed),
    )


def adapter_forward(x, prepped, *, max_tile=256):
    """x: (B, in_dim) float32. prepped: output of prepare_params()."""
    B, in_dim = x.shape
    p_in, _h1, _h2, out_dim, h1p, h2p = prepped["dims"]
    assert in_dim == p_in, "x feature dim does not match prepared params"

    tb = _pick_batch_tile(B, max_tile=max_tile, min_tiles=min_batch_tiles())
    bias_w = prepped["bias"].shape[1]
    args = (x, prepped["w1"], prepped["w2"], prepped["w3"], prepped["bias"])
    common = (B, in_dim, out_dim, h1p, h2p, tb, x.dtype,
              prepped["compute_dtype"], prepped["epilogue_dtype"], bias_w)

    try:
        out = _build_adapter_call(*common, True)(*args)
        return jax.block_until_ready(out)
    except Exception:
        # pl.Buffered(1) single-buffering is a pure-VMEM optimization; fall
        # back to default double buffering if this JAX rejects pipeline_mode.
        return _build_adapter_call(*common, False)(*args)


# ----------------------------------------------------------------------------
# Init (matches the PyTorch module) + pure-JAX reference
# ----------------------------------------------------------------------------
def xavier_uniform(key, fan_in, fan_out):
    # torch.nn.init.xavier_uniform_ bound; stored transposed as (fan_in, fan_out).
    bound = math.sqrt(6.0 / (fan_in + fan_out))
    return jax.random.uniform(key, (fan_in, fan_out), jnp.float32, -bound, bound)


def linear_bias(key, fan_in, fan_out):
    # PyTorch Linear default bias init: U(-1/sqrt(fan_in), 1/sqrt(fan_in)).
    bound = 1.0 / math.sqrt(fan_in)
    return jax.random.uniform(key, (1, fan_out), jnp.float32, -bound, bound)


def make_params(key, in_dim, out_dim):
    h1, h2 = in_dim // 2, in_dim // 4
    k = jax.random.split(key, 6)
    return {
        "w1": xavier_uniform(k[0], in_dim, h1), "b1": linear_bias(k[1], in_dim, h1),
        "w2": xavier_uniform(k[2], h1, h2), "b2": linear_bias(k[3], h1, h2),
        "w3": xavier_uniform(k[4], h2, out_dim), "b3": linear_bias(k[5], h2, out_dim),
    }


def adapter_ref(x, p):
    relu = lambda v: jnp.maximum(v, 0.0)
    h = relu(x @ p["w1"] + p["b1"])
    h = relu(h @ p["w2"] + p["b2"])
    return relu(h @ p["w3"] + p["b3"])


if __name__ == "__main__":
    key = jax.random.PRNGKey(0)
    kx, kp = jax.random.split(key)

    batch, in_dim, out_dim = 16, 32, 16   # hidden dims: 16, 8
    x = jax.random.normal(kx, (batch, in_dim), jnp.float32)
    params = make_params(kp, in_dim, out_dim)

    # One-time weight prep (padding / casting hoisted out of the forward path).
    prepped = jax.block_until_ready(prepare_params(params))

    out = jax.block_until_ready(adapter_forward(x, prepped))

    ref = adapter_ref(x, params)
    assert out.shape == (batch, out_dim)
    # bf16 MXU operands with f32 accumulation vs f32 reference -> loose tolerance.
    assert jnp.allclose(out, ref, atol=3e-2, rtol=3e-2), "mismatch vs reference"

    print("KERNEL_OK")
</pallas_src>

<mosaic_0001>
module attributes {stable_mosaic.version = 11 : i64} {
  func.func @adapter_kernel(%arg0: i32, %arg1: memref<16x32xf32, #tpu.memory_space<vmem>>, %arg2: memref<32x128xbf16, #tpu.memory_space<vmem>>, %arg3: memref<128x128xbf16, #tpu.memory_space<vmem>>, %arg4: memref<128x16xbf16, #tpu.memory_space<vmem>>, %arg5: memref<1x272xf32, #tpu.memory_space<vmem>>, %arg6: memref<16x16xf32, #tpu.memory_space<vmem>>) attributes {dimension_semantics = [#tpu.dimension_semantics<parallel>], iteration_bounds = array<i64: 1>, scalar_prefetch = 0 : i64, scratch_operands = 0 : i64, tpu.core_type = #tpu.core_type<tc>, window_params = [{transform_indices = @transform_0, window_bounds = array<i64: 16, 32>}, {pipeline_mode = #tpu.pipeline_mode<synchronous>, transform_indices = @transform_1, window_bounds = array<i64: 32, 128>}, {pipeline_mode = #tpu.pipeline_mode<synchronous>, transform_indices = @transform_2, window_bounds = array<i64: 128, 128>}, {pipeline_mode = #tpu.pipeline_mode<synchronous>, transform_indices = @transform_3, window_bounds = array<i64: 128, 16>}, {pipeline_mode = #tpu.pipeline_mode<synchronous>, transform_indices = @transform_4, window_bounds = array<i64: 1, 272>}, {transform_indices = @transform_5, window_bounds = array<i64: 16, 16>}]} {
    %c0 = arith.constant 0 : index
    %c0_0 = arith.constant 0 : index
    %0 = vector.load %arg1[%c0, %c0_0] : memref<16x32xf32, #tpu.memory_space<vmem>>, vector<16x32xf32>
    %1 = arith.truncf %0 : vector<16x32xf32> to vector<16x32xbf16>
    %c0_1 = arith.constant 0 : index
    %c0_2 = arith.constant 0 : index
    %2 = vector.load %arg2[%c0_1, %c0_2] : memref<32x128xbf16, #tpu.memory_space<vmem>>, vector<32x128xbf16>
    %cst = arith.constant dense<0.000000e+00> : vector<16x128xf32>
    %3 = tpu.matmul %1, %2, %cst {dimension_numbers = #tpu.dot_dimension_numbers<[1], [0], [0], [1], [0, 0, 1, 1], [], []>} : vector<16x32xbf16>, vector<32x128xbf16>, vector<16x128xf32> -> vector<16x128xf32>
    %c0_3 = arith.constant 0 : index
    %c0_4 = arith.constant 0 : index
    %4 = vector.load %arg5[%c0_3, %c0_4] : memref<1x272xf32, #tpu.memory_space<vmem>>, vector<1x128xf32>
    %5 = vector.broadcast %4 : vector<1x128xf32> to vector<16x128xf32>
    %6 = arith.addf %3, %5 : vector<16x128xf32>
    %cst_5 = arith.constant 0.000000e+00 : f32
    %7 = vector.broadcast %cst_5 : f32 to vector<16x128xf32>
    %8 = arith.maximumf %6, %7 : vector<16x128xf32>
    %9 = arith.truncf %8 : vector<16x128xf32> to vector<16x128xbf16>
    %c0_6 = arith.constant 0 : index
    %c0_7 = arith.constant 0 : index
    %10 = vector.load %arg3[%c0_6, %c0_7] : memref<128x128xbf16, #tpu.memory_space<vmem>>, vector<128x128xbf16>
    %cst_8 = arith.constant dense<0.000000e+00> : vector<16x128xf32>
    %11 = tpu.matmul %9, %10, %cst_8 {dimension_numbers = #tpu.dot_dimension_numbers<[1], [0], [0], [1], [0, 0, 1, 1], [], []>} : vector<16x128xbf16>, vector<128x128xbf16>, vector<16x128xf32> -> vector<16x128xf32>
    %c0_9 = arith.constant 0 : index
    %c128 = arith.constant 128 : index
    %12 = vector.load %arg5[%c0_9, %c128] : memref<1x272xf32, #tpu.memory_space<vmem>>, vector<1x128xf32>
    %13 = vector.broadcast %12 : vector<1x128xf32> to vector<16x128xf32>
    %14 = arith.addf %11, %13 : vector<16x128xf32>
    %cst_10 = arith.constant 0.000000e+00 : f32
    %15 = vector.broadcast %cst_10 : f32 to vector<16x128xf32>
    %16 = arith.maximumf %14, %15 : vector<16x128xf32>
    %17 = arith.truncf %16 : vector<16x128xf32> to vector<16x128xbf16>
    %c0_11 = arith.constant 0 : index
    %c0_12 = arith.constant 0 : index
    %18 = vector.load %arg4[%c0_11, %c0_12] : memref<128x16xbf16, #tpu.memory_space<vmem>>, vector<128x16xbf16>
    %cst_13 = arith.constant dense<0.000000e+00> : vector<16x16xf32>
    %19 = tpu.matmul %17, %18, %cst_13 {dimension_numbers = #tpu.dot_dimension_numbers<[1], [0], [0], [1], [0, 0, 1, 1], [], []>} : vector<16x128xbf16>, vector<128x16xbf16>, vector<16x16xf32> -> vector<16x16xf32>
    %c0_14 = arith.constant 0 : index
    %c256 = arith.constant 256 : index
    %20 = vector.load %arg5[%c0_14, %c256] : memref<1x272xf32, #tpu.memory_space<vmem>>, vector<1x16xf32>
    %21 = vector.broadcast %20 : vector<1x16xf32> to vector<16x16xf32>
    %22 = arith.addf %19, %21 : vector<16x16xf32>
    %cst_15 = arith.constant 0.000000e+00 : f32
    %23 = vector.broadcast %cst_15 : f32 to vector<16x16xf32>
    %24 = arith.maximumf %22, %23 : vector<16x16xf32>
    %c0_16 = arith.constant 0 : index
    %c0_17 = arith.constant 0 : index
    %25 = vector.load %arg6[%c0_16, %c0_17] : memref<16x16xf32, #tpu.memory_space<vmem>>, vector<16x16xf32>
    tpu.vector_store %arg6[%c0_16, %c0_17], %24 {strides = array<i32>} : memref<16x16xf32, #tpu.memory_space<vmem>>, vector<16x16xf32>,
    return
  }
  func.func @transform_0(%arg0: i32) -> (i32, i32) {
    %c0_i32 = arith.constant 0 : i32
    %c0_i32_0 = arith.constant 0 : i32
    return %arg0, %c0_i32 : i32, i32
  }
  func.func @transform_1(%arg0: i32) -> (i32, i32) {
    %c0_i32 = arith.constant 0 : i32
    %c0_i32_0 = arith.constant 0 : i32
    %c0_i32_1 = arith.constant 0 : i32
    return %c0_i32, %c0_i32_0 : i32, i32
  }
  func.func @transform_2(%arg0: i32) -> (i32, i32) {
    %c0_i32 = arith.constant 0 : i32
    %c0_i32_0 = arith.constant 0 : i32
    %c0_i32_1 = arith.constant 0 : i32
    return %c0_i32, %c0_i32_0 : i32, i32
  }
  func.func @transform_3(%arg0: i32) -> (i32, i32) {
    %c0_i32 = arith.constant 0 : i32
    %c0_i32_0 = arith.constant 0 : i32
    %c0_i32_1 = arith.constant 0 : i32
    return %c0_i32, %c0_i32_0 : i32, i32
  }
  func.func @transform_4(%arg0: i32) -> (i32, i32) {
    %c0_i32 = arith.constant 0 : i32
    %c0_i32_0 = arith.constant 0 : i32
    %c0_i32_1 = arith.constant 0 : i32
    return %c0_i32, %c0_i32_0 : i32, i32
  }
  func.func @transform_5(%arg0: i32) -> (i32, i32) {
    %c0_i32 = arith.constant 0 : i32
    %c0_i32_0 = arith.constant 0 : i32
    return %arg0, %c0_i32 : i32, i32
  }
}

module attributes {stable_mosaic.version = 11 : i64} {
  func.func @adapter_kernel(%arg0: i32, %arg1: memref<16x32xf32, #tpu.memory_space<vmem>>, %arg2: memref<32x128xbf16, #tpu.memory_space<vmem>>, %arg3: memref<128x128xbf16, #tpu.memory_space<vmem>>, %arg4: memref<128x16xbf16, #tpu.memory_space<vmem>>, %arg5: memref<1x272xf32, #tpu.memory_space<vmem>>, %arg6: memref<16x16xf32, #tpu.memory_space<vmem>>) attributes {dimension_semantics = [#tpu.dimension_semantics<parallel>], iteration_bounds = array<i64: 1>, scalar_prefetch = 0 : i64, scratch_operands = 0 : i64, tpu.core_type = #tpu.core_type<tc>, window_params = [{transform_indices = @transform_0, window_bounds = array<i64: 16, 32>}, {pipeline_mode = #tpu.pipeline_mode<synchronous>, transform_indices = @transform_1, window_bounds = array<i64: 32, 128>}, {pipeline_mode = #tpu.pipeline_mode<synchronous>, transform_indices = @transform_2, window_bounds = array<i64: 128, 128>}, {pipeline_mode = #tpu.pipeline_mode<synchronous>, transform_indices = @transform_3, window_bounds = array<i64: 128, 16>}, {pipeline_mode = #tpu.pipeline_mode<synchronous>, transform_indices = @transform_4, window_bounds = array<i64: 1, 272>}, {transform_indices = @transform_5, window_bounds = array<i64: 16, 16>}]} {
    %c0 = arith.constant 0 : index
    %c0_0 = arith.constant 0 : index
    %0 = vector.load %arg1[%c0, %c0_0] : memref<16x32xf32, #tpu.memory_space<vmem>>, vector<16x32xf32>
    %1 = arith.truncf %0 : vector<16x32xf32> to vector<16x32xbf16>
    %c0_1 = arith.constant 0 : index
    %c0_2 = arith.constant 0 : index
    %2 = vector.load %arg2[%c0_1, %c0_2] : memref<32x128xbf16, #tpu.memory_space<vmem>>, vector<32x128xbf16>
    %cst = arith.constant dense<0.000000e+00> : vector<16x128xf32>
    %3 = tpu.matmul %1, %2, %cst {dimension_numbers = #tpu.dot_dimension_numbers<[1], [0], [0], [1], [0, 0, 1, 1], [], []>} : vector<16x32xbf16>, vector<32x128xbf16>, vector<16x128xf32> -> vector<16x128xf32>
    %c0_3 = arith.constant 0 : index
    %c0_4 = arith.constant 0 : index
    %4 = vector.load %arg5[%c0_3, %c0_4] : memref<1x272xf32, #tpu.memory_space<vmem>>, vector<1x128xf32>
    %5 = vector.broadcast %4 : vector<1x128xf32> to vector<16x128xf32>
    %6 = arith.addf %3, %5 : vector<16x128xf32>
    %cst_5 = arith.constant 0.000000e+00 : f32
    %7 = vector.broadcast %cst_5 : f32 to vector<16x128xf32>
    %8 = arith.maximumf %6, %7 : vector<16x128xf32>
    %9 = arith.truncf %8 : vector<16x128xf32> to vector<16x128xbf16>
    %c0_6 = arith.constant 0 : index
    %c0_7 = arith.constant 0 : index
    %10 = vector.load %arg3[%c0_6, %c0_7] : memref<128x128xbf16, #tpu.memory_space<vmem>>, vector<128x128xbf16>
    %cst_8 = arith.constant dense<0.000000e+00> : vector<16x128xf32>
    %11 = tpu.matmul %9, %10, %cst_8 {dimension_numbers = #tpu.dot_dimension_numbers<[1], [0], [0], [1], [0, 0, 1, 1], [], []>} : vector<16x128xbf16>, vector<128x128xbf16>, vector<16x128xf32> -> vector<16x128xf32>
    %c0_9 = arith.constant 0 : index
    %c128 = arith.constant 128 : index
    %12 = vector.load %arg5[%c0_9, %c128] : memref<1x272xf32, #tpu.memory_space<vmem>>, vector<1x128xf32>
    %13 = vector.broadcast %12 : vector<1x128xf32> to vector<16x128xf32>
    %14 = arith.addf %11, %13 : vector<16x128xf32>
    %cst_10 = arith.constant 0.000000e+00 : f32
    %15 = vector.broadcast %cst_10 : f32 to vector<16x128xf32>
    %16 = arith.maximumf %14, %15 : vector<16x128xf32>
    %17 = arith.truncf %16 : vector<16x128xf32> to vector<16x128xbf16>
    %c0_11 = arith.constant 0 : index
    %c0_12 = arith.constant 0 : index
    %18 = vector.load %arg4[%c0_11, %c0_12] : memref<128x16xbf16, #tpu.memory_space<vmem>>, vector<128x16xbf16>
    %cst_13 = arith.constant dense<0.000000e+00> : vector<16x16xf32>
    %19 = tpu.matmul %17, %18, %cst_13 {dimension_numbers = #tpu.dot_dimension_numbers<[1], [0], [0], [1], [0, 0, 1, 1], [], []>} : vector<16x128xbf16>, vector<128x16xbf16>, vector<16x16xf32> -> vector<16x16xf32>
    %c0_14 = arith.constant 0 : index
    %c256 = arith.constant 256 : index
    %20 = vector.load %arg5[%c0_14, %c256] : memref<1x272xf32, #tpu.memory_space<vmem>>, vector<1x16xf32>
    %21 = vector.broadcast %20 : vector<1x16xf32> to vector<16x16xf32>
    %22 = arith.addf %19, %21 : vector<16x16xf32>
    %cst_15 = arith.constant 0.000000e+00 : f32
    %23 = vector.broadcast %cst_15 : f32 to vector<16x16xf32>
    %24 = arith.maximumf %22, %23 : vector<16x16xf32>
    %c0_16 = arith.constant 0 : index
    %c0_17 = arith.constant 0 : index
    %25 = vector.load %arg6[%c0_16, %c0_17] : memref<16x16xf32, #tpu.memory_space<vmem>>, vector<16x16xf32>
    tpu.vector_store %arg6[%c0_16, %c0_17], %24 {strides = array<i32>} : memref<16x16xf32, #tpu.memory_space<vmem>>, vector<16x16xf32>,
    return
  }
  func.func @transform_0(%arg0: i32) -> (i32, i32) {
    %c0_i32 = arith.constant 0 : i32
    %c0_i32_0 = arith.constant 0 : i32
    return %arg0, %c0_i32 : i32, i32
  }
  func.func @transform_1(%arg0: i32) -> (i32, i32) {
    %c0_i32 = arith.constant 0 : i32
    %c0_i32_0 = arith.constant 0 : i32
    %c0_i32_1 = arith.constant 0 : i32
    return %c0_i32, %c0_i32_0 : i32, i32
  }
  func.func @transform_2(%arg0: i32) -> (i32, i32) {
    %c0_i32 = arith.constant 0 : i32
    %c0_i32_0 = arith.constant 0 : i32
    %c0_i32_1 = arith.constant 0 : i32
    return %c0_i32, %c0_i32_0 : i32, i32
  }
  func.func @transform_3(%arg0: i32) -> (i32, i32) {
    %c0_i32 = arith.constant 0 : i32
    %c0_i32_0 = arith.constant 0 : i32
    %c0_i32_1 = arith.constant 0 : i32
    return %c0_i32, %c0_i32_0 : i32, i32
  }
  func.func @transform_4(%arg0: i32) -> (i32, i32) {
    %c0_i32 = arith.constant 0 : i32
    %c0_i32_0 = arith.constant 0 : i32
    %c0_i32_1 = arith.constant 0 : i32
    return %c0_i32, %c0_i32_0 : i32, i32
  }
  func.func @transform_5(%arg0: i32) -> (i32, i32) {
    %c0_i32 = arith.constant 0 : i32
    %c0_i32_0 = arith.constant 0 : i32
    return %arg0, %c0_i32 : i32, i32
  }
}

</mosaic_0001>

<bundles_post_ra>
// kernel: tpu_custom_call.1
= control target key start
LH: loop header
LB: loop body
LE: loop exit
PB: predicated region body
PF: predicated region fallthrough
CT: control target
= control target key end

     0   :  { %10 = vsyncpa [#allocation3], 0  ;;  %s726_s0 = inlined_call_operand.hbm [shape: f32[16,32], index: 0, kind: input, shape index: {}]   ;;  %s727_s1 = inlined_call_operand.hbm [shape: bf16[32,128], index: 1, kind: input, shape index: {}]   ;;  %s728_s2 = inlined_call_operand.vmem [shape: bf16[128,128], index: 2, kind: input, shape index: {}]   ;;  %s729_s3 = inlined_call_operand.vmem [shape: bf16[128,16], index: 3, kind: input, shape index: {}]   ;;  %s730_s4 = inlined_call_operand.vmem [shape: f32[1,272], index: 4, kind: input, shape index: {}]   ;;  %s731_s5 = inlined_call_operand.hbm [shape: f32[16,16], index: 5, kind: output, shape index: {}]  }
   0x1   :  { %11 = vsyncpa [#allocation6], 0 }
   0x2   :  { %12 = vsyncpa [#allocation4], 0  ;;  %s564_s18 = smov [#allocation2]   ;;  %s492_s22 = scalar_lea.hbm %s726_s0, 256 }
   0x3   :  { %s18_s19 = sshll.u32 %s564_s18, 4  ;;  %p493_p0 = scmp.ne.s32.totalorder %s726_s0, %s492_s22  ;;  %s19_s19 = int_to_ptr.vmem [resolvable:$true] %s18_s19 }
   0x4   :  { %p496_p1 = scmp.lt.u32.totalorder %s492_s22, %s726_s0 }
   0x6   :  { %p498_p2 = pnand %p496_p1, %p493_p0 }
   0x8   :  { %501 = shalt.err (!%p498_p2)
}
   0x9   :  { %s502_s27 = scalar_lea.vmem %s19_s19, 256  ;;  %p507_p4 = scmp.lt.s32.totalorder %s19_s19, %s19_s19 }
   0xa   :  { %p503_p3 = scmp.ne.s32.totalorder %s19_s19, %s502_s27  ;;  %p508_p5 = scmp.lt.s32.totalorder %s502_s27, %s502_s27 }
   0xc   :  { %p509_p6 = por %p508_p5, %p507_p4 }
   0xe   :  { %p510_p7 = pnand %p509_p6, %p503_p3 }
  0x10   :  { %513 = shalt.err (!%p510_p7)
}
  0x11   :  { %s565_s28 = smov 128   ;;  %s566_s29 = smov 8  }
  0x12   :  { %24 = dma.hbm_to_vmem [thread:$0]  %s726_s0, 256, %s19_s19, [#allocation3], %s565_s28, %s565_s28, %s566_s29  }
  0x13   :  { %s567_s7 = smov [#allocation5]   ;;  %s514_s11 = scalar_lea.hbm %s727_s1, 256 }
  0x14   :  { %s30_s8 = sshll.u32 %s567_s7, 4  ;;  %p515_p8 = scmp.ne.s32.totalorder %s727_s1, %s514_s11  ;;  %s31_s8 = int_to_ptr.vmem [resolvable:$true] %s30_s8 }
  0x15   :  { %p518_p9 = scmp.lt.u32.totalorder %s514_s11, %s727_s1 }
  0x17   :  { %p520_p10 = pnand %p518_p9, %p515_p8 }
  0x19   :  { %523 = shalt.err (!%p520_p10)
}
  0x1a   :  { %s524_s16 = scalar_lea.vmem %s31_s8, 256  ;;  %p529_p12 = scmp.lt.s32.totalorder %s31_s8, %s31_s8 }
  0x1b   :  { %p525_p11 = scmp.ne.s32.totalorder %s31_s8, %s524_s16  ;;  %p530_p13 = scmp.lt.s32.totalorder %s524_s16, %s524_s16 }
  0x1d   :  { %p531_p0 = por %p530_p13, %p529_p12 }
  0x1f   :  { %p532_p1 = pnand %p531_p0, %p525_p11 }
  0x21   :  { %535 = shalt.err (!%p532_p1)
}
  0x22   :  { %s568_s0 = smov 64   ;;  %s569_s17 = smov 4  }
  0x23   :  { %36 = dma.hbm_to_vmem [thread:$0]  %s727_s1, 256, %s31_s8, [#allocation6], %s568_s0, %s568_s0, %s569_s17  }
  0x24   :  { %558 = dma.done.wait [#allocation3], 256  }
  0x25   :  { %559 = vsyncadd [#allocation3], 4294967040 }
  0x26   :  { %560 = dma.done.wait [#allocation6], 256  }
  0x27   :  { %561 = vsyncadd [#allocation6], 4294967040  ;;  %v570_v0 = vmov 0.0   ;;  %vm571_vm0 = vmmov 0   ;;  %v474_v1 = vld [vmem:[#allocation5] sm:$0xff]   ;;  %v475_v2 = vld [vmem:[#allocation5 + $0x8] sm:$0xff]  }
  0x28   :  { %417 = vmatprep.subr.bf16.mxu0 %v570_v0  ;;  %421 = vmatprep.mubr.msk.bf16.mxu0 %vm571_vm0, %v570_v0  ;;  %v50_v3 = vld [vmem:[#allocation2] sm:$0xff]  ;;  %v51_v4 = vld [vmem:[#allocation2 + $0x8] sm:$0xff]  ;;  %vm76_vm1 = vcmask 261120   ;;  %v478_v8 = vld [vmem:[%s728_s2 + $0x10] sm:$0xff]   ;;  %vm353_vm2 = vcmask 130048  }
  0x29   :  { %425 = vmatprep.subr.bf16.mxu1 %v570_v0  ;;  %441 = vmatprep.mubr.msk.bf16.mxu1 %vm571_vm0, %v570_v0  ;;  %v476_v5 = vld [vmem:[%s728_s2] sm:$0xff]   ;;  %v52_v6 = vpack.c.bf16 %v51_v4, %v50_v3  ;;  %v477_v7 = vld [vmem:[%s728_s2 + $0x8] sm:$0xff]   ;;  %v479_v9 = vld [vmem:[%s728_s2 + $0x18] sm:$0xff]  }
  0x2a   :  { %418 = vmatpush3.bf16.msra.mxu0 %v474_v1  ;;  %426 = vmatpush3.bf16.msra.mxu1 %v476_v5  ;;  %v480_v10 = vld [vmem:[%s728_s2 + $0x20] sm:$0xff]   ;;  %v481_v11 = vld [vmem:[%s728_s2 + $0x28] sm:$0xff]   ;;  %v482_v12 = vld [vmem:[%s728_s2 + $0x30] sm:$0xff]  }
  0x2b   :  { %419 = vmatprep.subr.bf16.mxu0 %v570_v0  ;;  %427 = vmatprep.subr.bf16.mxu1 %v570_v0  ;;  %v483_v13 = vld [vmem:[%s728_s2 + $0x38] sm:$0xff]   ;;  %v484_v14 = vld [vmem:[%s729_s3] sm:$0xff]   ;;  %v485_v15 = vld [vmem:[%s729_s3 + $0x8] sm:$0xff]  }
  0x2c   :  { %v486_v16 = vld [vmem:[%s729_s3 + $0x10] sm:$0xff]   ;;  %v487_v17 = vld [vmem:[%s729_s3 + $0x18] sm:$0xff]   ;;  %v488_v18 = vld [vmem:[%s729_s3 + $0x20] sm:$0xff]  }
  0x2d   :  { %v489_v19 = vld [vmem:[%s729_s3 + $0x28] sm:$0xff]   ;;  %v374_v20 = vld [vmem:[%s730_s4] ss:$0 sm:$0xff]  ;;  %v490_v30 = vld [vmem:[%s729_s3 + $0x30] sm:$0xff]  }
  0x2e   :  { %420 = vmatpush3.bf16.msra.mxu0 %v475_v2  ;;  %428 = vmatpush3.bf16.msra.mxu1 %v477_v7  ;;  %v491_v31 = vld [vmem:[%s729_s3 + $0x38] sm:$0xff]   ;;  %v378_v32 = vld [vmem:[%s730_s4 + $0x1] ss:$0 sm:$0xff]  ;;  %v387_v42 = vld [vmem:[%s730_s4 + $0x2] ss:$0 sm:$0xff]  ;;  %s572_s3 = smov [#allocation7]  }
  0x2f   :  { %445 = vmatprep.subr.bf16.mxu0 %v570_v0  ;;  %429 = vmatprep.subr.bf16.mxu1 %v570_v0  ;;  %s361_s8 = sshll.u32 %s572_s3, 4  ;;  %s362_s8 = int_to_ptr.vmem [resolvable:$true] %s361_s8 }
  0x30   :  { %s536_s9 = scalar_lea.vmem %s362_s8, 256  ;;  %p541_p3 = scmp.lt.s32.totalorder %s362_s8, %s362_s8 }
  0x31   :  { %422 = vmatmul.mubr.msk.bf16.vlgmr.msra.gmra.mrb[0].mxu0 %vm76_vm1, %v52_v6  ;;  %p537_p2 = scmp.ne.s32.totalorder %s362_s8, %s536_s9  ;;  %p542_p4 = scmp.lt.s32.totalorder %s536_s9, %s536_s9 }
  0x32   :  { %461 = vmatprep.mubr.msk.bf16.mxu0 %vm571_vm0, %v570_v0  ;;  %430 = vmatpush3.bf16.msra.mxu1 %v478_v8 }
  0x33   :  { %431 = vmatprep.subr.bf16.mxu1 %v570_v0  ;;  %446 = vmatpush3.bf16.msra.mxu0 %v484_v14  ;;  %p543_p5 = por %p542_p4, %p541_p3 }
  0x34   :  { %447 = vmatprep.subr.bf16.mxu0 %v570_v0 }
  0x35   :  { %p544_p6 = pnand %p543_p5, %p537_p2 }
  0x36   :  { %432 = vmatpush3.bf16.msra.mxu1 %v479_v9 }
  0x37   :  { %433 = vmatprep.subr.bf16.mxu1 %v570_v0  ;;  %448 = vmatpush3.bf16.msra.mxu0 %v485_v15 }
  0x38   :  { %449 = vmatprep.subr.bf16.mxu0 %v570_v0 }
  0x3a   :  { %434 = vmatpush3.bf16.msra.mxu1 %v480_v10 }
  0x3b   :  { %435 = vmatprep.subr.bf16.mxu1 %v570_v0  ;;  %450 = vmatpush3.bf16.msra.mxu0 %v486_v16 }
  0x3c   :  { %451 = vmatprep.subr.bf16.mxu0 %v570_v0 }
  0x3e   :  { %436 = vmatpush3.bf16.msra.mxu1 %v481_v11 }
  0x3f   :  { %437 = vmatprep.subr.bf16.mxu1 %v570_v0  ;;  %452 = vmatpush3.bf16.msra.mxu0 %v487_v17 }
  0x40   :  { %453 = vmatprep.subr.bf16.mxu0 %v570_v0 }
  0x42   :  { %438 = vmatpush3.bf16.msra.mxu1 %v482_v12 }
  0x43   :  { %439 = vmatprep.subr.bf16.mxu1 %v570_v0  ;;  %454 = vmatpush3.bf16.msra.mxu0 %v488_v18 }
  0x44   :  { %455 = vmatprep.subr.bf16.mxu0 %v570_v0 }
  0x46   :  { %440 = vmatpush3.bf16.msra.mxu1 %v483_v13 }
  0x47   :  { %456 = vmatpush3.bf16.msra.mxu0 %v489_v19 }
  0x48   :  { %457 = vmatprep.subr.bf16.mxu0 %v570_v0 }
  0x4b   :  { %458 = vmatpush3.bf16.msra.mxu0 %v490_v30 }
  0x4c   :  { %459 = vmatprep.subr.bf16.mxu0 %v570_v0 }
  0x4f   :  { %460 = vmatpush3.bf16.msra.mxu0 %v491_v31 }
 0x104   :  { %v114_v21 = vpop.f32.mrb[0].mxu0 }
 0x105   :  { %v115_v22 = vadd.f32 %v374_v20, %v114_v21  ;;  %v423_v23 = vpop.f32.mrb[1].mxu0 }
 0x106   :  { %v117_v24 = vpop.f32.mrb[2].mxu0 }
 0x107   :  { %v118_v25 = vadd.f32 %v374_v20, %v117_v24  ;;  %v424_v26 = vpop.f32.mrb[3].mxu0  ;;  %v121_v27 = vmax.f32 %v115_v22, 0.0 }
 0x109   :  { %v122_v28 = vmax.f32 %v118_v25, 0.0 }
 0x10b   :  { %v123_v29 = vpack.c.bf16 %v122_v28, %v121_v27 }
 0x10d   :  { %442 = vmatmul.mubr.bf16.vlgmr.msra.gmra.mrb[0].mxu1 %v123_v29 }
 0x1e0   :  { %v229_v33 = vpop.f32.mrb[0].mxu1 }
 0x1e1   :  { %v230_v34 = vadd.f32 %v378_v32, %v229_v33  ;;  %v443_v35 = vpop.f32.mrb[1].mxu1 }
 0x1e2   :  { %v232_v36 = vpop.f32.mrb[2].mxu1 }
 0x1e3   :  { %v233_v37 = vadd.f32 %v378_v32, %v232_v36  ;;  %v444_v38 = vpop.f32.mrb[3].mxu1  ;;  %v236_v39 = vmax.f32 %v230_v34, 0.0 }
 0x1e5   :  { %v237_v40 = vmax.f32 %v233_v37, 0.0 }
 0x1e7   :  { %v238_v41 = vpack.c.bf16 %v237_v40, %v236_v39 }
 0x1e9   :  { %462 = vmatmul.mubr.bf16.vlgmr.msra.gmra.mrb[4].mxu0 %v238_v41 }
 0x2bc   :  { %v344_v43 = vpop.f32.mrb[4].mxu0 }
 0x2bd   :  { %v345_v44 = vadd.f32 %v387_v42, %v344_v43  ;;  %v463_v45 = vpop.f32.mrb[5].mxu0 }
 0x2be   :  { %v347_v46 = vpop.f32.mrb[6].mxu0 }
 0x2bf   :  { %v351_v47 = vmax.f32 %v345_v44, 0.0  ;;  %v348_v48 = vadd.f32 %v387_v42, %v347_v46  ;;  %v464_v49 = vpop.f32.mrb[7].mxu0 }
 0x2c1   :  { %v352_v50 = vmax.f32 %v348_v48, 0.0  ;;  %354 = vst.msk [vmem:[#allocation7] sm:$0xff] %vm353_vm2, %v351_v47 }
 0x2c3   :  { %355 = vst.msk [vmem:[#allocation7 + $0x8] sm:$0xff] %vm353_vm2, %v352_v50 }
 0x2c4   :  { %547 = shalt.err (!%p544_p6)
}
 0x2c5   :  { %s548_s11 = scalar_lea.hbm %s731_s5, 256 }
 0x2c6   :  { %p549_p7 = scmp.ne.s32.totalorder %s731_s5, %s548_s11  ;;  %p552_p8 = scmp.lt.u32.totalorder %s548_s11, %s731_s5 }
 0x2c8   :  { %p554_p9 = pnand %p552_p8, %p549_p7 }
 0x2ca   :  { %557 = shalt.err (!%p554_p9)
}
 0x2cb   :  { %367 = dma.vmem_to_hbm [thread:$0]  %s362_s8, 256, %s731_s5, [#allocation4], %s565_s28, %s565_s28, %s566_s29  }
 0x2cc   :  { %562 = dma.done.wait [#allocation4], 256  }
 0x2cd   :  { %563 = vsyncadd [#allocation4], 4294967040 }
 0x2ce   :  { %371 = vsyncpa [#allocation3], 1 }
 0x2cf   :  { %372 = vsyncpa [#allocation6], 1 }
 0x2d0   :  { %373 = vsyncpa [#allocation4], 1 }

// kernel: tpu_custom_call.1
= control target key start
LH: loop header
LB: loop body
LE: loop exit
PB: predicated region body
PF: predicated region fallthrough
CT: control target
= control target key end

     0   :  { %10 = vsyncpa [#allocation3], 0  ;;  %s726_s0 = inlined_call_operand.hbm [shape: f32[16,32], index: 0, kind: input, shape index: {}]   ;;  %s727_s1 = inlined_call_operand.hbm [shape: bf16[32,128], index: 1, kind: input, shape index: {}]   ;;  %s728_s2 = inlined_call_operand.vmem [shape: bf16[128,128], index: 2, kind: input, shape index: {}]   ;;  %s729_s3 = inlined_call_operand.vmem [shape: bf16[128,16], index: 3, kind: input, shape index: {}]   ;;  %s730_s4 = inlined_call_operand.vmem [shape: f32[1,272], index: 4, kind: input, shape index: {}]   ;;  %s731_s5 = inlined_call_operand.hbm [shape: f32[16,16], index: 5, kind: output, shape index: {}]  }
   0x1   :  { %11 = vsyncpa [#allocation6], 0 }
   0x2   :  { %12 = vsyncpa [#allocation4], 0  ;;  %s564_s18 = smov [#allocation2]   ;;  %s492_s22 = scalar_lea.hbm %s726_s0, 256 }
   0x3   :  { %s18_s19 = sshll.u32 %s564_s18, 4  ;;  %p493_p0 = scmp.ne.s32.totalorder %s726_s0, %s492_s22  ;;  %s19_s19 = int_to_ptr.vmem [resolvable:$true] %s18_s19 }
   0x4   :  { %p496_p1 = scmp.lt.u32.totalorder %s492_s22, %s726_s0 }
   0x6   :  { %p498_p2 = pnand %p496_p1, %p493_p0 }
   0x8   :  { %501 = shalt.err (!%p498_p2)
}
   0x9   :  { %s502_s27 = scalar_lea.vmem %s19_s19, 256  ;;  %p507_p4 = scmp.lt.s32.totalorder %s19_s19, %s19_s19 }
   0xa   :  { %p503_p3 = scmp.ne.s32.totalorder %s19_s19, %s502_s27  ;;  %p508_p5 = scmp.lt.s32.totalorder %s502_s27, %s502_s27 }
   0xc   :  { %p509_p6 = por %p508_p5, %p507_p4 }
   0xe   :  { %p510_p7 = pnand %p509_p6, %p503_p3 }
  0x10   :  { %513 = shalt.err (!%p510_p7)
}
  0x11   :  { %s565_s28 = smov 128   ;;  %s566_s29 = smov 8  }
  0x12   :  { %24 = dma.hbm_to_vmem [thread:$0]  %s726_s0, 256, %s19_s19, [#allocation3], %s565_s28, %s565_s28, %s566_s29  }
  0x13   :  { %s567_s7 = smov [#allocation5]   ;;  %s514_s11 = scalar_lea.hbm %s727_s1, 256 }
  0x14   :  { %s30_s8 = sshll.u32 %s567_s7, 4  ;;  %p515_p8 = scmp.ne.s32.totalorder %s727_s1, %s514_s11  ;;  %s31_s8 = int_to_ptr.vmem [resolvable:$true] %s30_s8 }
  0x15   :  { %p518_p9 = scmp.lt.u32.totalorder %s514_s11, %s727_s1 }
  0x17   :  { %p520_p10 = pnand %p518_p9, %p515_p8 }
  0x19   :  { %523 = shalt.err (!%p520_p10)
}
  0x1a   :  { %s524_s16 = scalar_lea.vmem %s31_s8, 256  ;;  %p529_p12 = scmp.lt.s32.totalorder %s31_s8, %s31_s8 }
  0x1b   :  { %p525_p11 = scmp.ne.s32.totalorder %s31_s8, %s524_s16  ;;  %p530_p13 = scmp.lt.s32.totalorder %s524_s16, %s524_s16 }
  0x1d   :  { %p531_p0 = por %p530_p13, %p529_p12 }
  0x1f   :  { %p532_p1 = pnand %p531_p0, %p525_p11 }
  0x21   :  { %535 = shalt.err (!%p532_p1)
}
  0x22   :  { %s568_s0 = smov 64   ;;  %s569_s17 = smov 4  }
  0x23   :  { %36 = dma.hbm_to_vmem [thread:$0]  %s727_s1, 256, %s31_s8, [#allocation6], %s568_s0, %s568_s0, %s569_s17  }
  0x24   :  { %558 = dma.done.wait [#allocation3], 256  }
  0x25   :  { %559 = vsyncadd [#allocation3], 4294967040 }
  0x26   :  { %560 = dma.done.wait [#allocation6], 256  }
  0x27   :  { %561 = vsyncadd [#allocation6], 4294967040  ;;  %v570_v0 = vmov 0.0   ;;  %vm571_vm0 = vmmov 0   ;;  %v474_v1 = vld [vmem:[#allocation5] sm:$0xff]   ;;  %v475_v2 = vld [vmem:[#allocation5 + $0x8] sm:$0xff]  }
  0x28   :  { %417 = vmatprep.subr.bf16.mxu0 %v570_v0  ;;  %421 = vmatprep.mubr.msk.bf16.mxu0 %vm571_vm0, %v570_v0  ;;  %v50_v3 = vld [vmem:[#allocation2] sm:$0xff]  ;;  %v51_v4 = vld [vmem:[#allocation2 + $0x8] sm:$0xff]  ;;  %vm76_vm1 = vcmask 261120   ;;  %v478_v8 = vld [vmem:[%s728_s2 + $0x10] sm:$0xff]   ;;  %vm353_vm2 = vcmask 130048  }
  0x29   :  { %425 = vmatprep.subr.bf16.mxu1 %v570_v0  ;;  %441 = vmatprep.mubr.msk.bf16.mxu1 %vm571_vm0, %v570_v0  ;;  %v476_v5 = vld [vmem:[%s728_s2] sm:$0xff]   ;;  %v52_v6 = vpack.c.bf16 %v51_v4, %v50_v3  ;;  %v477_v7 = vld [vmem:[%s728_s2 + $0x8] sm:$0xff]   ;;  %v479_v9 = vld [vmem:[%s728_s2 + $0x18] sm:$0xff]  }
  0x2a   :  { %418 = vmatpush3.bf16.msra.mxu0 %v474_v1  ;;  %426 = vmatpush3.bf16.msra.mxu1 %v476_v5  ;;  %v480_v10 = vld [vmem:[%s728_s2 + $0x20] sm:$0xff]   ;;  %v481_v11 = vld [vmem:[%s728_s2 + $0x28] sm:$0xff]   ;;  %v482_v12 = vld [vmem:[%s728_s2 + $0x30] sm:$0xff]  }
  0x2b   :  { %419 = vmatprep.subr.bf16.mxu0 %v570_v0  ;;  %427 = vmatprep.subr.bf16.mxu1 %v570_v0  ;;  %v483_v13 = vld [vmem:[%s728_s2 + $0x38] sm:$0xff]   ;;  %v484_v14 = vld [vmem:[%s729_s3] sm:$0xff]   ;;  %v485_v15 = vld [vmem:[%s729_s3 + $0x8] sm:$0xff]  }
  0x2c   :  { %v486_v16 = vld [vmem:[%s729_s3 + $0x10] sm:$0xff]   ;;  %v487_v17 = vld [vmem:[%s729_s3 + $0x18] sm:$0xff]   ;;  %v488_v18 = vld [vmem:[%s729_s3 + $0x20] sm:$0xff]  }
  0x2d   :  { %v489_v19 = vld [vmem:[%s729_s3 + $0x28] sm:$0xff]   ;;  %v374_v20 = vld [vmem:[%s730_s4] ss:$0 sm:$0xff]  ;;  %v490_v30 = vld [vmem:[%s729_s3 + $0x30] sm:$0xff]  }
  0x2e   :  { %420 = vmatpush3.bf16.msra.mxu0 %v475_v2  ;;  %428 = vmatpush3.bf16.msra.mxu1 %v477_v7  ;;  %v491_v31 = vld [vmem:[%s729_s3 + $0x38] sm:$0xff]   ;;  %v378_v32 = vld [vmem:[%s730_s4 + $0x1] ss:$0 sm:$0xff]  ;;  %v387_v42 = vld [vmem:[%s730_s4 + $0x2] ss:$0 sm:$0xff]  ;;  %s572_s3 = smov [#allocation7]  }
  0x2f   :  { %445 = vmatprep.subr.bf16.mxu0 %v570_v0  ;;  %429 = vmatprep.subr.bf16.mxu1 %v570_v0  ;;  %s361_s8 = sshll.u32 %s572_s3, 4  ;;  %s362_s8 = int_to_ptr.vmem [resolvable:$true] %s361_s8 }
  0x30   :  { %s536_s9 = scalar_lea.vmem %s362_s8, 256  ;;  %p541_p3 = scmp.lt.s32.totalorder %s362_s8, %s362_s8 }
  0x31   :  { %422 = vmatmul.mubr.msk.bf16.vlgmr.msra.gmra.mrb[0].mxu0 %vm76_vm1, %v52_v6  ;;  %p537_p2 = scmp.ne.s32.totalorder %s362_s8, %s536_s9  ;;  %p542_p4 = scmp.lt.s32.totalorder %s536_s9, %s536_s9 }
  0x32   :  { %461 = vmatprep.mubr.msk.bf16.mxu0 %vm571_vm0, %v570_v0  ;;  %430 = vmatpush3.bf16.msra.mxu1 %v478_v8 }
  0x33   :  { %431 = vmatprep.subr.bf16.mxu1 %v570_v0  ;;  %446 = vmatpush3.bf16.msra.mxu0 %v484_v14  ;;  %p543_p5 = por %p542_p4, %p541_p3 }
  0x34   :  { %447 = vmatprep.subr.bf16.mxu0 %v570_v0 }
  0x35   :  { %p544_p6 = pnand %p543_p5, %p537_p2 }
  0x36   :  { %432 = vmatpush3.bf16.msra.mxu1 %v479_v9 }
  0x37   :  { %433 = vmatprep.subr.bf16.mxu1 %v570_v0  ;;  %448 = vmatpush3.bf16.msra.mxu0 %v485_v15 }
  0x38   :  { %449 = vmatprep.subr.bf16.mxu0 %v570_v0 }
  0x3a   :  { %434 = vmatpush3.bf16.msra.mxu1 %v480_v10 }
  0x3b   :  { %435 = vmatprep.subr.bf16.mxu1 %v570_v0  ;;  %450 = vmatpush3.bf16.msra.mxu0 %v486_v16 }
  0x3c   :  { %451 = vmatprep.subr.bf16.mxu0 %v570_v0 }
  0x3e   :  { %436 = vmatpush3.bf16.msra.mxu1 %v481_v11 }
  0x3f   :  { %437 = vmatprep.subr.bf16.mxu1 %v570_v0  ;;  %452 = vmatpush3.bf16.msra.mxu0 %v487_v17 }
  0x40   :  { %453 = vmatprep.subr.bf16.mxu0 %v570_v0 }
  0x42   :  { %438 = vmatpush3.bf16.msra.mxu1 %v482_v12 }
  0x43   :  { %439 = vmatprep.subr.bf16.mxu1 %v570_v0  ;;  %454 = vmatpush3.bf16.msra.mxu0 %v488_v18 }
  0x44   :  { %455 = vmatprep.subr.bf16.mxu0 %v570_v0 }
  0x46   :  { %440 = vmatpush3.bf16.msra.mxu1 %v483_v13 }
  0x47   :  { %456 = vmatpush3.bf16.msra.mxu0 %v489_v19 }
  0x48   :  { %457 = vmatprep.subr.bf16.mxu0 %v570_v0 }
  0x4b   :  { %458 = vmatpush3.bf16.msra.mxu0 %v490_v30 }
  0x4c   :  { %459 = vmatprep.subr.bf16.mxu0 %v570_v0 }
  0x4f   :  { %460 = vmatpush3.bf16.msra.mxu0 %v491_v31 }
 0x104   :  { %v114_v21 = vpop.f32.mrb[0].mxu0 }
 0x105   :  { %v115_v22 = vadd.f32 %v374_v20, %v114_v21  ;;  %v423_v23 = vpop.f32.mrb[1].mxu0 }
 0x106   :  { %v117_v24 = vpop.f32.mrb[2].mxu0 }
 0x107   :  { %v118_v25 = vadd.f32 %v374_v20, %v117_v24  ;;  %v424_v26 = vpop.f32.mrb[3].mxu0  ;;  %v121_v27 = vmax.f32 %v115_v22, 0.0 }
 0x109   :  { %v122_v28 = vmax.f32 %v118_v25, 0.0 }
 0x10b   :  { %v123_v29 = vpack.c.bf16 %v122_v28, %v121_v27 }
 0x10d   :  { %442 = vmatmul.mubr.bf16.vlgmr.msra.gmra.mrb[0].mxu1 %v123_v29 }
 0x1e0   :  { %v229_v33 = vpop.f32.mrb[0].mxu1 }
 0x1e1   :  { %v230_v34 = vadd.f32 %v378_v32, %v229_v33  ;;  %v443_v35 = vpop.f32.mrb[1].mxu1 }
 0x1e2   :  { %v232_v36 = vpop.f32.mrb[2].mxu1 }
 0x1e3   :  { %v233_v37 = vadd.f32 %v378_v32, %v232_v36  ;;  %v444_v38 = vpop.f32.mrb[3].mxu1  ;;  %v236_v39 = vmax.f32 %v230_v34, 0.0 }
 0x1e5   :  { %v237_v40 = vmax.f32 %v233_v37, 0.0 }
 0x1e7   :  { %v238_v41 = vpack.c.bf16 %v237_v40, %v236_v39 }
 0x1e9   :  { %462 = vmatmul.mubr.bf16.vlgmr.msra.gmra.mrb[4].mxu0 %v238_v41 }
 0x2bc   :  { %v344_v43 = vpop.f32.mrb[4].mxu0 }
 0x2bd   :  { %v345_v44 = vadd.f32 %v387_v42, %v344_v43  ;;  %v463_v45 = vpop.f32.mrb[5].mxu0 }
 0x2be   :  { %v347_v46 = vpop.f32.mrb[6].mxu0 }
 0x2bf   :  { %v351_v47 = vmax.f32 %v345_v44, 0.0  ;;  %v348_v48 = vadd.f32 %v387_v42, %v347_v46  ;;  %v464_v49 = vpop.f32.mrb[7].mxu0 }
 0x2c1   :  { %v352_v50 = vmax.f32 %v348_v48, 0.0  ;;  %354 = vst.msk [vmem:[#allocation7] sm:$0xff] %vm353_vm2, %v351_v47 }
 0x2c3   :  { %355 = vst.msk [vmem:[#allocation7 + $0x8] sm:$0xff] %vm353_vm2, %v352_v50 }
 0x2c4   :  { %547 = shalt.err (!%p544_p6)
}
 0x2c5   :  { %s548_s11 = scalar_lea.hbm %s731_s5, 256 }
 0x2c6   :  { %p549_p7 = scmp.ne.s32.totalorder %s731_s5, %s548_s11  ;;  %p552_p8 = scmp.lt.u32.totalorder %s548_s11, %s731_s5 }
 0x2c8   :  { %p554_p9 = pnand %p552_p8, %p549_p7 }
 0x2ca   :  { %557 = shalt.err (!%p554_p9)
}
 0x2cb   :  { %367 = dma.vmem_to_hbm [thread:$0]  %s362_s8, 256, %s731_s5, [#allocation4], %s565_s28, %s565_s28, %s566_s29  }
 0x2cc   :  { %562 = dma.done.wait [#allocation4], 256  }
 0x2cd   :  { %563 = vsyncadd [#allocation4], 4294967040 }
 0x2ce   :  { %371 = vsyncpa [#allocation3], 1 }
 0x2cf   :  { %372 = vsyncpa [#allocation6], 1 }
 0x2d0   :  { %373 = vsyncpa [#allocation4], 1 }

</bundles_post_ra>
